<compile_context>
chip_gen: v7x
topology: tpu7x:2x2x1
jax: 0.10.0
libtpu: 0.0.40
codegen_flags: <defaults>
</compile_context>

<pallas_src>
import math

import jax
import jax.numpy as jnp
from jax.experimental import pallas as pl
from jax.experimental.pallas import tpu as pltpu


def _round_up(x, m):
    return ((x + m - 1) // m) * m


def _pick_tile(dim, align, max_tile):
    """Largest multiple of `align` that divides `dim` and is <= max_tile."""
    assert dim % align == 0, (dim, align)
    if dim <= max_tile:
        return dim
    t = (max_tile // align) * align
    while t >= align:
        if dim % t == 0:
            return t
        t -= align
    return align


def _matmul_kernel_acc(a_ref, b_ref, o_ref, acc_ref):
    """Tiled matmul with multi-step K reduction: grid = (M/tm, N/tn, K/tk)."""
    @pl.when(pl.program_id(2) == 0)
    def _init():
        acc_ref[...] = jnp.zeros_like(acc_ref)

    acc_ref[...] += jnp.dot(
        a_ref[...], b_ref[...], preferred_element_type=jnp.float32
    )

    @pl.when(pl.program_id(2) == pl.num_programs(2) - 1)
    def _finalize():
        o_ref[...] = acc_ref[...].astype(o_ref.dtype)


def _matmul_kernel_single_k(a_ref, b_ref, o_ref):
    """Single K step: no accumulator scratch, direct store. grid = (M/tm, N/tn)."""
    o_ref[...] = jnp.dot(
        a_ref[...], b_ref[...], preferred_element_type=jnp.float32
    ).astype(o_ref.dtype)


def _pallas_matmul_aligned(a, b, *, out_dtype,
                           tm_max=512, tn_max=512, tk_max=1024,
                           vmem_limit_bytes=40 * 1024 * 1024):
    """out = a @ b for pre-aligned inputs (M % 8/16 == 0, K % 128 == 0, N % 128 == 0).

    No padding, casting or slicing happens here — callers align once up front.
    Accumulation is always f32 (VMEM scratch or preferred_element_type).
    """
    m, k = a.shape
    k2, n = b.shape
    assert k == k2, "contraction dims must match"
    m_align = 16 if a.dtype == jnp.bfloat16 else 8
    assert m % m_align == 0 and k % 128 == 0 and n % 128 == 0, (a.shape, b.shape)

    tm = _pick_tile(m, m_align, tm_max)
    tk = _pick_tile(k, 128, tk_max)
    tn = _pick_tile(n, 128, tn_max)

    # v7x megacore: guarantee >= 2 blocks on a parallel axis so both
    # TensorCores get work; costs one extra ~0.35us grid step on v5e/v6e.
    if (m // tm) * (n // tn) == 1 and m >= 128 and (m // 2) % m_align == 0:
        tm = m // 2

    grid_m, grid_n, grid_k = m // tm, n // tn, k // tk

    itemsize_a = jnp.dtype(a.dtype).itemsize
    itemsize_b = jnp.dtype(b.dtype).itemsize
    cost = pl.CostEstimate(
        flops=2 * m * n * k,
        transcendentals=0,
        # Account for grid re-reads of each operand (advisory only).
        bytes_accessed=(grid_n * m * k * itemsize_a
                        + grid_m * k * n * itemsize_b
                        + m * n * jnp.dtype(out_dtype).itemsize),
    )
    cparams = dict(vmem_limit_bytes=vmem_limit_bytes)

    if grid_k == 1:
        # Whole contraction in one step: skip the f32 scratch entirely.
        return pl.pallas_call(
            _matmul_kernel_single_k,
            out_shape=jax.ShapeDtypeStruct((m, n), out_dtype),
            grid_spec=pltpu.PrefetchScalarGridSpec(
                num_scalar_prefetch=0,
                grid=(grid_m, grid_n),
                in_specs=[
                    pl.BlockSpec((tm, k), lambda i, j: (i, 0)),
                    pl.BlockSpec((k, tn), lambda i, j: (0, j)),
                ],
                out_specs=pl.BlockSpec((tm, tn), lambda i, j: (i, j)),
            ),
            compiler_params=pltpu.CompilerParams(
                dimension_semantics=("parallel", "parallel"), **cparams),
            cost_estimate=cost,
        )(a, b)

    return pl.pallas_call(
        _matmul_kernel_acc,
        out_shape=jax.ShapeDtypeStruct((m, n), out_dtype),
        grid_spec=pltpu.PrefetchScalarGridSpec(
            num_scalar_prefetch=0,
            grid=(grid_m, grid_n, grid_k),
            in_specs=[
                pl.BlockSpec((tm, tk), lambda i, j, kk: (i, kk)),
                pl.BlockSpec((tk, tn), lambda i, j, kk: (kk, j)),
            ],
            out_specs=pl.BlockSpec((tm, tn), lambda i, j, kk: (i, j)),
            scratch_shapes=[pltpu.VMEM((tm, tn), jnp.float32)],
        ),
        compiler_params=pltpu.CompilerParams(
            dimension_semantics=("parallel", "parallel", "arbitrary"), **cparams),
        cost_estimate=cost,
    )(a, b)


def gcn_layer(x, weight, a_norm, *, compute_dtype=None,
              tm_max=512, tn_max=512, tk_max=1024):
    """Pallas GCN layer: out = A_norm @ (x @ W)  (torch.mm(A_norm, torch.mm(x, W))).

    compute_dtype=jnp.bfloat16 enables the bf16-MXU / f32-accumulate fast path
    (halves adjacency DMA bytes; for production store A_norm as bf16 up front
    so even the single upfront cast disappears).
    """
    n, f_in = x.shape
    f_in_w, f_out = weight.shape
    assert f_in == f_in_w
    assert a_norm.shape == (n, n)
    out_dtype = x.dtype
    cdt = compute_dtype if compute_dtype is not None else x.dtype

    # --- one-time cast (outside the per-matmul hot path) -------------------
    if a_norm.dtype != cdt:
        a_norm = a_norm.astype(cdt)
    if x.dtype != cdt:
        x = x.astype(cdt)
    if weight.dtype != cdt:
        weight = weight.astype(cdt)

    # --- one-time minimal zero-padding to 128 granularity -------------------
    # Every GCN dim (N, F_in, F_out) appears as a lane / contraction dim in
    # one of the two matmuls, so 128 alignment is required; 128 also satisfies
    # the 8/16 sublane alignment.  Padding is worst-case (1 + 127/N)^2 for the
    # adjacency — no tile-sized blow-up.  (Avoiding even this pad would need
    # in-kernel K-tail masking; not worth it here.)
    n_p = _round_up(n, 128)
    f_in_p = _round_up(f_in, 128)
    f_out_p = _round_up(f_out, 128)
    if n_p != n:
        a_norm = jnp.pad(a_norm, ((0, n_p - n), (0, n_p - n)))
    if (n_p, f_in_p) != (n, f_in):
        x = jnp.pad(x, ((0, n_p - n), (0, f_in_p - f_in)))
    if (f_in_p, f_out_p) != (f_in, f_out):
        weight = jnp.pad(weight, ((0, f_in_p - f_in), (0, f_out_p - f_out)))

    kw = dict(tm_max=tm_max, tn_max=tn_max, tk_max=tk_max)
    if f_in <= f_out:
        # (A_norm @ x) @ W — the N^2-scale matmul contracts against the
        # smaller feature dim: fewer MXU flops, identical math.
        h = _pallas_matmul_aligned(a_norm, x, out_dtype=cdt, **kw)
        out = _pallas_matmul_aligned(h, weight, out_dtype=out_dtype, **kw)
    else:
        # Original order: support = x @ W, out = A_norm @ support.
        support = _pallas_matmul_aligned(x, weight, out_dtype=cdt, **kw)
        out = _pallas_matmul_aligned(a_norm, support, out_dtype=out_dtype, **kw)

    if (n_p, f_out_p) != (n, f_out):
        out = out[:n, :f_out]
    return out


def xavier_uniform(key, shape, dtype=jnp.float32):
    fan_in, fan_out = shape
    bound = math.sqrt(6.0 / (fan_in + fan_out))
    return jax.random.uniform(key, shape, dtype=dtype, minval=-bound, maxval=bound)


def _make_problem(key, n, f_in, f_out):
    k_w, k_x, k_a = jax.random.split(key, 3)
    weight = xavier_uniform(k_w, (f_in, f_out))
    x = jax.random.normal(k_x, (n, f_in), dtype=jnp.float32)
    adj = jax.random.uniform(k_a, (n, n), dtype=jnp.float32)
    adj = (adj + adj.T) * 0.5 + jnp.eye(n)                    # symmetric, self-loops
    deg = jnp.sum(adj, axis=1)
    d_inv_sqrt = 1.0 / jnp.sqrt(deg)
    a_norm = adj * d_inv_sqrt[:, None] * d_inv_sqrt[None, :]  # D^-1/2 A D^-1/2
    return x, weight, a_norm


if __name__ == "__main__":
    key = jax.random.PRNGKey(0)
    k1, k2, k3 = jax.random.split(key, 3)

    # 1) Demo shape (aligned): N=128, F_in=64, F_out=128. f32 path.
    x, w, a = _make_problem(k1, 128, 64, 128)
    ref = a @ (x @ w)
    out = jax.block_until_ready(gcn_layer(x, w, a))
    assert out.shape == (128, 128)
    assert jnp.allclose(out, ref, atol=1e-3, rtol=1e-3), "f32 mismatch vs reference"

    # 2) bf16-MXU / f32-accumulate fast path (looser tolerance).
    out_bf16 = jax.block_until_ready(gcn_layer(x, w, a, compute_dtype=jnp.bfloat16))
    assert jnp.allclose(out_bf16, ref, atol=1e-1, rtol=1e-1), "bf16 mismatch vs reference"

    # 3) Unaligned shapes + F_in > F_out (original contraction order, pad/trim).
    x2, w2, a2 = _make_problem(k2, 200, 96, 48)
    ref2 = a2 @ (x2 @ w2)
    out2 = jax.block_until_ready(gcn_layer(x2, w2, a2))
    assert out2.shape == (200, 48)
    assert jnp.allclose(out2, ref2, atol=1e-3, rtol=1e-3), "unaligned mismatch vs reference"

    # 4) Force a multi-step K reduction (exercises the f32 accumulator kernel).
    x3, w3, a3 = _make_problem(k3, 256, 64, 128)
    ref3 = a3 @ (x3 @ w3)
    out3 = jax.block_until_ready(gcn_layer(x3, w3, a3, tm_max=128, tk_max=128))
    assert jnp.allclose(out3, ref3, atol=1e-3, rtol=1e-3), "multi-K mismatch vs reference"

    print("KERNEL_OK")
</pallas_src>

<mosaic_0001>
module attributes {stable_mosaic.version = 11 : i64} {
  func.func @_matmul_kernel_single_k(%arg0: i32, %arg1: i32, %arg2: memref<64x128xf32, #tpu.memory_space<vmem>>, %arg3: memref<128x128xf32, #tpu.memory_space<vmem>>, %arg4: memref<64x128xf32, #tpu.memory_space<vmem>>) attributes {dimension_semantics = [#tpu.dimension_semantics<parallel>, #tpu.dimension_semantics<parallel>], iteration_bounds = array<i64: 2, 1>, scalar_prefetch = 0 : i64, scratch_operands = 0 : i64, tpu.core_type = #tpu.core_type<tc>, window_params = [{transform_indices = @transform_0, window_bounds = array<i64: 64, 128>}, {transform_indices = @transform_1, window_bounds = array<i64: 128, 128>}, {transform_indices = @transform_2, window_bounds = array<i64: 64, 128>}]} {
    %c0 = arith.constant 0 : index
    %c0_0 = arith.constant 0 : index
    %0 = vector.load %arg2[%c0, %c0_0] : memref<64x128xf32, #tpu.memory_space<vmem>>, vector<64x128xf32>
    %c0_1 = arith.constant 0 : index
    %c0_2 = arith.constant 0 : index
    %1 = vector.load %arg3[%c0_1, %c0_2] : memref<128x128xf32, #tpu.memory_space<vmem>>, vector<128x128xf32>
    %cst = arith.constant dense<0.000000e+00> : vector<64x128xf32>
    %2 = tpu.matmul %0, %1, %cst {dimension_numbers = #tpu.dot_dimension_numbers<[1], [0], [0], [1], [0, 0, 1, 1], [], []>} : vector<64x128xf32>, vector<128x128xf32>, vector<64x128xf32> -> vector<64x128xf32>
    %c0_3 = arith.constant 0 : index
    %c0_4 = arith.constant 0 : index
    %3 = vector.load %arg4[%c0_3, %c0_4] : memref<64x128xf32, #tpu.memory_space<vmem>>, vector<64x128xf32>
    tpu.vector_store %arg4[%c0_3, %c0_4], %2 {strides = array<i32>} : memref<64x128xf32, #tpu.memory_space<vmem>>, vector<64x128xf32>,
    return
  }
  func.func @transform_0(%arg0: i32, %arg1: i32) -> (i32, i32) {
    %c0_i32 = arith.constant 0 : i32
    %c0_i32_0 = arith.constant 0 : i32
    return %arg0, %c0_i32 : i32, i32
  }
  func.func @transform_1(%arg0: i32, %arg1: i32) -> (i32, i32) {
    %c0_i32 = arith.constant 0 : i32
    %c0_i32_0 = arith.constant 0 : i32
    return %c0_i32, %arg1 : i32, i32
  }
  func.func @transform_2(%arg0: i32, %arg1: i32) -> (i32, i32) {
    %c0_i32 = arith.constant 0 : i32
    return %arg0, %arg1 : i32, i32
  }
}

</mosaic_0001>

<bundles_post_ra>
// kernel: tpu_custom_call.1
= control target key start
LH: loop header
LB: loop body
LE: loop exit
PB: predicated region body
PF: predicated region fallthrough
CT: control target
= control target key end

     0   :  { %7 = vsyncpa [#allocation3], 0  ;;  %s1066_s0 = inlined_call_operand.hbm [shape: f32[128,128], index: 0, kind: input, shape index: {}]   ;;  %s1067_s1 = inlined_call_operand.hbm [shape: f32[128,128], index: 1, kind: input, shape index: {}]   ;;  %s1068_s2 = inlined_call_operand.hbm [shape: f32[128,128], index: 2, kind: output, shape index: {}]  }
   0x1   :  { %9 = vsyncpa [#allocation3 + $0x1], 0 }
   0x2   :  { %10 = vsyncpa [#allocation6], 0 }
   0x3   :  { %11 = vsyncpa [#allocation4], 0 }
   0x4   :  { %13 = vsyncpa [#allocation4 + $0x1], 0  ;;  %s827_s9 = smov 0   ;;  %s829_s10 = smov 0  }
   0x5   :  { %s831_s11 = smov 0   ;;  %s833_s12 = smov 0  }
   0x6   :  { %s835_s13 = smov 0   ;;  %s837_s14 = smov 0  }
   0x7 LB: > { %s447_s15 = sadd.s32 4294967295, %s803_s14   ;;  %s448_s16 = sadd.s32 4294967294, %s803_s14   ;;  %s803_s14 = sphi %s837_s14, %s19_s14   ;;  %s799_s13 = sphi %s835_s13, %s1092_s13   ;;  %s795_s12 = sphi %s833_s12, %s1091_s12   ;;  %s791_s11 = sphi %s831_s11, %s1090_s11   ;;  %s787_s10 = sphi %s829_s10, %s1089_s10   ;;  %s783_s9 = sphi %s827_s9, %s1088_s9  }
   0x8   : > { %p51_p0 = scmp.ne.s32.totalorder %s787_s10, %s783_s9  ;;  %p861_p1 = scmp.eq.s32.totalorder %s447_s15, 0 }
   0x9   : > { %p865_p2 = scmp.eq.s32.totalorder %s447_s15, 1  ;;  %p109_p3 = scmp.eq.s32.totalorder %s448_s16, 1 }
   0xa   : > { %s1073_s17 = scalar_select %p861_p1, 1, 0 }
   0xb   : > { %s1074_s18 = scalar_select %p865_p2, 1, 0 }
   0xc   : > { %p871_p4 = por %p861_p1, %p51_p0  ;;  %p449_p5 = scmp.ge.s32.totalorder %s803_s14, 1 }
   0xd   : > { %p876_p6 = por %p109_p3, %p51_p0  ;;  %p116_p7 = scmp.lt.s32.totalorder %s803_s14, 3 }
   0xe   : > { %s1075_s19 = scalar_select %p871_p4, 1, 0 }
   0xf   : > { %s1076_s20 = scalar_select %p876_p6, 1, 0 }
  0x10   : > { %p881_p8 = pnand %p449_p5, %p116_p7  ;;  %s805_s22 = smov [#allocation5]  }
  0x11   : > { %s130_s23 = sshll.u32 %s805_s22, 4  ;;  %s31_s25 = sadd.s32 1, %s799_s13  ;;  %s131_s23 = int_to_ptr.vmem [resolvable:$true] %s130_s23 }
  0x12   : > { %s1077_s21 = scalar_select %p881_p8, 1, 0 }
  0x13   : > { %p590_p9 = pneg %p881_p8  ;;  %s659_s28 = scalar_lea.hbm %s1067_s1, 2048 }
  0x14   : > { %p660_p12 = scmp.ne.s32.totalorder %s1067_s1, %s659_s28  ;;  %p666_p5 = scmp.lt.u32.totalorder %s659_s28, %s1067_s1 }
  0x15   : > { %p890_p11 = pnand %p590_p9, %p861_p1 }
  0x17   : > { %p661_p13 = pneg %p890_p11 }
  0x19   : > { %p662_p0 = pnand %p661_p13, %p660_p12 }
  0x1b   : > { %p663_p3 = pneg %p662_p0 }
  0x1d   : > { %p668_p7 = pnand %p666_p5, %p663_p3 }
  0x1f   : > { %671 = shalt.err (!%p668_p7)
}
  0x20   : > { %s672_s5 = scalar_lea.vmem %s131_s23, 2048  ;;  %p680_p1 = scmp.lt.s32.totalorder %s131_s23, %s131_s23 }
  0x21   : > { %p673_p9 = scmp.ne.s32.totalorder %s131_s23, %s672_s5  ;;  %p681_p4 = scmp.lt.s32.totalorder %s672_s5, %s672_s5 }
  0x23   : > { %p675_p10 = pnand %p673_p9, %p661_p13  ;;  %p682_p8 = por %p681_p4, %p680_p1 }
  0x25   : > { %p676_p6 = pneg %p675_p10 }
  0x27   : > { %p683_p2 = pnand %p682_p8, %p676_p6 }
  0x29   : > { %686 = shalt.err (!%p683_p2)
}
  0x2a   : > { %s806_s6 = smov 128   ;;  %s807_s7 = smov 8  }
  0x2b   : > { %593 = dma.hbm_to_vmem [thread:$0]  (!%p890_p11), %s1067_s1, 2048, %s131_s23, [#allocation6], %s806_s6, %s806_s6, %s807_s7  }
  0x2c   : > { %p33_p1 = scmp.ge.s32.totalorder %s31_s25, 2  ;;  %s38_s16 = sadd.s32 1, %s791_s11 }
  0x2d   : > { %p45_p2 = scmp.ne.s32.totalorder %s791_s11, %s787_s10  ;;  %p46_p4 = scmp.eq.s32.totalorder %s803_s14, 0 }
  0x2e   : > { %s1094_s25 = smov (%p33_p1, %s31_s25), 0  ;;  %p1080_p8 = scmp.ne.s32.totalorder %s1074_s18, 0 }
  0x2f   : > { %p920_p6 = por %p46_p4, %p45_p2  ;;  %s35_s26 = ssub.s32 %s799_s13, %s1094_s25 }
  0x30   : > { %p926_p10 = por %p1080_p8, %p45_p2  ;;  %p603_p12 = scmp.lt.s32.totalorder %s803_s14, 2 }
  0x31   : > { %p36_p11 = scmp.eq.s32.totalorder %s35_s26, 0  ;;  %s144_s23 = sand.u32 1, %s791_s11  }
  0x32   : > { %s452_s27 = sshll.u32 %s144_s23, 6  ;;  %s464_s29 = sshll.u32 %s799_s13, 10 }
  0x33   : > { %s935_s28 = scalar_select %p36_p11, %s791_s11, %s38_s16  }
  0x34   : > { %s941_s4 = scalar_lea.hbm %s1066_s0, %s464_s29  ;;  %s148_s18 = scalar_lea.vmem [#allocation2], %s452_s27 }
  0x35   : > { %s155_s5 = sshll.u32 %s148_s18, 4  ;;  %p947_p13 = pnand %p603_p12, %p920_p6  ;;  %s943_s5 = int_to_ptr.vmem [resolvable:$true] %s155_s5 }
  0x36   : > { %s951_s15 = scalar_lea.sflag [#allocation3], %s144_s23  ;;  %s687_s16 = scalar_lea.hbm %s941_s4, 1024 }
  0x37   : > { %p688_p0 = scmp.ne.s32.totalorder %s941_s4, %s687_s16  ;;  %p689_p3 = pneg %p947_p13 }
  0x38   : > { %s692_s22 = scalar_lea.hbm %s1066_s0, 2048  ;;  %p693_p9 = scmp.lt.u32.totalorder %s941_s4, %s1066_s0 }
  0x39   : > { %p690_p5 = pnand %p689_p3, %p688_p0  ;;  %p694_p1 = scmp.lt.u32.totalorder %s692_s22, %s687_s16 }
  0x3a   : > { %p696_p4 = scmp.lt.u32.totalorder %s687_s16, %s941_s4 }
  0x3b   : > { %p691_p7 = pneg %p690_p5  ;;  %p695_p2 = por %p694_p1, %p693_p9 }
  0x3d   : > { %p697_p6 = por %p696_p4, %p695_p2 }
  0x3f   : > { %p698_p8 = pnand %p697_p6, %p691_p7 }
  0x41   : > { %701 = shalt.err (!%p698_p8)
}
  0x42   : > { %s702_s23 = scalar_lea.vmem %s943_s5, 1024  ;;  %s808_s3 = smov [#allocation2]  }
  0x43   : > { %p703_p12 = scmp.ne.s32.totalorder %s943_s5, %s702_s23  ;;  %s707_s18 = sshll.u32 %s808_s3, 4  ;;  %s708_s18 = int_to_ptr.vmem [resolvable:$false] %s707_s18 }
  0x44   : > { %s709_s26 = scalar_lea.vmem %s708_s18, 2048  ;;  %p710_p5 = scmp.lt.s32.totalorder %s943_s5, %s708_s18 }
  0x45   : > { %p705_p11 = pnand %p703_p12, %p689_p3  ;;  %p711_p9 = scmp.lt.s32.totalorder %s709_s26, %s702_s23 }
  0x47   : > { %p706_p0 = pneg %p705_p11  ;;  %p712_p1 = por %p711_p9, %p710_p5 }
  0x49   : > { %p713_p2 = pnand %p712_p1, %p706_p0 }
  0x4b   : > { %716 = shalt.err (!%p713_p2)
}
  0x4c   : > { %597 = dma.hbm_to_vmem [thread:$0]  (!%p947_p13), %s941_s4, 1024, %s943_s5, %s951_s15, %s806_s6, %s806_s6, %s807_s7  }
  0x4d   : > { %p1083_p3 = scmp.ne.s32.totalorder %s1077_s21, 0 }
  0x4e   : > { %s985_s16 = sand.u32 (!%p1083_p3), 1, %s787_s10   ;;  %p1084_p7 = scmp.ne.s32.totalorder (!%p1083_p3), %s1075_s19, 0 }
  0x4f   : > { %167 = sbr.rel (%p1083_p3) target bundleno = 357 (0x165), region = 28  ;;  %s456_s27 = sshll.u32 (!%p1083_p3), %s985_s16, 6 }
  0x50   : > { %s170_s22 = scalar_lea.sflag (!%p1083_p3), [#allocation3], %s985_s16  ;;  %s991_s8 = scalar_lea.vmem (!%p1083_p3), [#allocation2], %s456_s27 }
  0x56   : > { %770 = dma.done.wait (%p1084_p7), %s170_s22, 1024  }
  0x57   : > { %772 = vsyncadd (%p1084_p7), %s170_s22, 4294966272  ;;  %p1085_p13 = scmp.ne.s32.totalorder %s1073_s17, 0 }
  0x59   : > { %774 = dma.done.wait (%p1085_p13), [#allocation6], 2048  }
  0x5a   : > { %776 = vsyncadd (%p1085_p13), [#allocation6], 4294965248  ;;  %v208_v0 = vld [vmem:[#allocation5] sm:$0xff]  ;;  %v209_v1 = vld [vmem:[#allocation5 + $0x8] sm:$0xff]  ;;  %s197_s17 = scalar_lea.vmem [#allocation7], %s456_s27  ;;  %s465_s21 = sshll.u32 %s795_s12, 10 }
  0x5b   : > { %v210_v2 = vld [vmem:[#allocation5 + $0x10] sm:$0xff]  ;;  %v534_v3 = vpack.c.bf16 %v209_v1, %v208_v0  ;;  %v211_v4 = vld [vmem:[#allocation5 + $0x18] sm:$0xff]  ;;  %v212_v6 = vld [vmem:[#allocation5 + $0x20] sm:$0xff]  ;;  %s352_s19 = sshll.u32 %s197_s17, 4  ;;  %s1017_s4 = scalar_lea.hbm %s1068_s2, %s465_s21  ;;  %s1012_s19 = int_to_ptr.vmem [resolvable:$true] %s352_s19 }
  0x5c   : > { %v538_v5 = vpack.c.bf16 %v211_v4, %v210_v2  ;;  %v213_v7 = vld [vmem:[#allocation5 + $0x28] sm:$0xff]  ;;  %v200_v9 = vld [vmem:[%s991_s8] sm:$0xff]  ;;  %v214_v11 = vld [vmem:[#allocation5 + $0x30] sm:$0xff]  ;;  %s338_s12 = scalar_lea.sflag [#allocation4], %s985_s16  ;;  %s717_s5 = scalar_lea.vmem %s1012_s19, 1024 }
  0x5d   : > { %535 = vmatprep.subr.bf16.mxu0 %v534_v3  ;;  %566 = vmatprep.subr.bf16.mxu1 %v534_v3  ;;  %v542_v8 = vpack.c.bf16 %v213_v7, %v212_v6  ;;  %v204_v10 = vld [vmem:[%s991_s8 + $0x20] sm:$0xff]  ;;  %v215_v12 = vld [vmem:[#allocation5 + $0x38] sm:$0xff]  ;;  %v217_v15 = vld [vmem:[#allocation5 + $0x48] sm:$0xff]  ;;  %p718_p4 = scmp.ne.s32.totalorder %s1012_s19, %s717_s5  ;;  %s809_s15 = smov [#allocation7]  }
  0x5e   : > { %537 = vmatpush3.bf16.msra.mxu0 %v534_v3  ;;  %574 = vmatpush3.bf16.msra.mxu1 %v534_v3  ;;  %v546_v13 = vpack.c.bf16 %v215_v12, %v214_v11  ;;  %v216_v14 = vld [vmem:[#allocation5 + $0x40] sm:$0xff]  ;;  %v218_v17 = vld [vmem:[#allocation5 + $0x50] sm:$0xff]  ;;  %v219_v18 = vld [vmem:[#allocation5 + $0x58] sm:$0xff]  ;;  %s721_s29 = sshll.u32 %s809_s15, 4  ;;  %s722_s29 = int_to_ptr.vmem [resolvable:$false] %s721_s29 }
  0x5f   : > { %539 = vmatprep.subr.bf16.mxu0 %v538_v5  ;;  %567 = vmatprep.subr.bf16.mxu1 %v538_v5  ;;  %v550_v16 = vpack.c.bf16 %v217_v15, %v216_v14  ;;  %v554_v19 = vpack.c.bf16 %v219_v18, %v218_v17  ;;  %v220_v20 = vld [vmem:[#allocation5 + $0x60] sm:$0xff]  ;;  %v221_v21 = vld [vmem:[#allocation5 + $0x68] sm:$0xff]  ;;  %v222_v23 = vld [vmem:[#allocation5 + $0x70] sm:$0xff]  ;;  %p719_p6 = pnand %p718_p4, %p926_p10  ;;  %s723_s30 = scalar_lea.vmem %s722_s29, 2048 }
  0x60   : > { %522 = vmatprep.mubr.f32.mxu0 %v200_v9  ;;  %528 = vmatprep.mubr.f32.mxu1 %v204_v10  ;;  %v558_v22 = vpack.c.bf16 %v221_v21, %v220_v20  ;;  %v223_v24 = vld [vmem:[#allocation5 + $0x78] sm:$0xff]  ;;  %v201_v26 = vld [vmem:[%s991_s8 + $0x8] sm:$0xff]  ;;  %v202_v28 = vld [vmem:[%s991_s8 + $0x10] sm:$0xff]  ;;  %p724_p12 = scmp.lt.s32.totalorder %s1012_s19, %s722_s29  ;;  %p725_p11 = scmp.lt.s32.totalorder %s723_s30, %s717_s5 }
  0x61   : > { %v562_v25 = vpack.c.bf16 %v223_v24, %v222_v23  ;;  %v205_v27 = vld [vmem:[%s991_s8 + $0x28] sm:$0xff]  ;;  %v206_v29 = vld [vmem:[%s991_s8 + $0x30] sm:$0xff]  ;;  %v203_v30 = vld [vmem:[%s991_s8 + $0x18] sm:$0xff]  ;;  %p720_p8 = pneg %p719_p6 }
  0x62   : > { %541 = vmatpush3.bf16.msra.mxu0 %v538_v5  ;;  %575 = vmatpush3.bf16.msra.mxu1 %v538_v5  ;;  %v207_v31 = vld [vmem:[%s991_s8 + $0x38] sm:$0xff]  ;;  %p726_p0 = por %p725_p11, %p724_p12 }
  0x63   : > { %543 = vmatprep.subr.bf16.mxu0 %v542_v8  ;;  %568 = vmatprep.subr.bf16.mxu1 %v542_v8 }
  0x64   : > { %p727_p5 = pnand %p726_p0, %p720_p8 }
  0x66   : > { %545 = vmatpush3.bf16.msra.mxu0 %v542_v8  ;;  %576 = vmatpush3.bf16.msra.mxu1 %v542_v8 }
  0x67   : > { %547 = vmatprep.subr.bf16.mxu0 %v546_v13  ;;  %569 = vmatprep.subr.bf16.mxu1 %v546_v13 }
  0x6a   : > { %549 = vmatpush3.bf16.msra.mxu0 %v546_v13  ;;  %577 = vmatpush3.bf16.msra.mxu1 %v546_v13 }
  0x6b   : > { %551 = vmatprep.subr.bf16.mxu0 %v550_v16  ;;  %570 = vmatprep.subr.bf16.mxu1 %v550_v16 }
  0x6e   : > { %553 = vmatpush3.bf16.msra.mxu0 %v550_v16  ;;  %578 = vmatpush3.bf16.msra.mxu1 %v550_v16 }
  0x6f   : > { %555 = vmatprep.subr.bf16.mxu0 %v554_v19  ;;  %571 = vmatprep.subr.bf16.mxu1 %v554_v19 }
  0x72   : > { %557 = vmatpush3.bf16.msra.mxu0 %v554_v19  ;;  %579 = vmatpush3.bf16.msra.mxu1 %v554_v19 }
  0x73   : > { %559 = vmatprep.subr.bf16.mxu0 %v558_v22  ;;  %572 = vmatprep.subr.bf16.mxu1 %v558_v22 }
  0x76   : > { %561 = vmatpush3.bf16.msra.mxu0 %v558_v22  ;;  %580 = vmatpush3.bf16.msra.mxu1 %v558_v22 }
  0x77   : > { %563 = vmatprep.subr.bf16.mxu0 %v562_v25  ;;  %573 = vmatprep.subr.bf16.mxu1 %v562_v25 }
  0x7a   : > { %565 = vmatpush3.bf16.msra.mxu0 %v562_v25  ;;  %581 = vmatpush3.bf16.msra.mxu1 %v562_v25 }
  0x7d   : > { %523 = vmatmul.mubr.f32.vlgmr.msra.gmra.mrb[0].mxu0 %v201_v26  ;;  %529 = vmatmul.mubr.f32.vlgmr.msra.gmra.mrb[0].mxu1 %v205_v27 }
  0x7e   : > { %525 = vmatprep.mubr.f32.mxu0 %v202_v28  ;;  %531 = vmatprep.mubr.f32.mxu1 %v206_v29 }
  0x81   : > { %526 = vmatmul.mubr.f32.gmra.mrb[2].mxu0 %v203_v30  ;;  %532 = vmatmul.mubr.f32.gmra.mrb[2].mxu1 %v207_v31 }
 0x150   : > { %v524_v32 = vpop.f32.mrb[0].mxu0  ;;  %v530_v33 = vpop.f32.mrb[0].mxu1 }
 0x151   : > { %330 = vst [vmem:[%s197_s17 + $0x8] sm:$0xff] %v524_v32  ;;  %334 = vst [vmem:[%s197_s17 + $0x28] sm:$0xff] %v530_v33  ;;  %v290_v34 = vpop.f32.mrb[1].mxu0  ;;  %v310_v35 = vpop.f32.mrb[1].mxu1 }
 0x152   : > { %329 = vst [vmem:[%s197_s17] sm:$0xff] %v290_v34  ;;  %333 = vst [vmem:[%s197_s17 + $0x20] sm:$0xff] %v310_v35 }
 0x154   : > { %v527_v36 = vpop.f32.mrb[2].mxu0  ;;  %v533_v37 = vpop.f32.mrb[2].mxu1 }
 0x155   : > { %332 = vst [vmem:[%s197_s17 + $0x18] sm:$0xff] %v527_v36  ;;  %336 = vst [vmem:[%s197_s17 + $0x38] sm:$0xff] %v533_v37  ;;  %v300_v38 = vpop.f32.mrb[3].mxu0  ;;  %v320_v39 = vpop.f32.mrb[3].mxu1 }
 0x156   : > { %331 = vst [vmem:[%s197_s17 + $0x10] sm:$0xff] %v300_v38  ;;  %335 = vst [vmem:[%s197_s17 + $0x30] sm:$0xff] %v320_v39 }
 0x157   : > { %730 = shalt.err (!%p727_p5)
}
 0x158   : > { %s731_s23 = scalar_lea.hbm %s1017_s4, 1024  ;;  %s735_s26 = scalar_lea.hbm %s1068_s2, 2048 }
 0x159   : > { %p732_p9 = scmp.ne.s32.totalorder %s1017_s4, %s731_s23  ;;  %p736_p3 = scmp.lt.u32.totalorder %s1017_s4, %s1068_s2 }
 0x15a   : > { %p737_p7 = scmp.lt.u32.totalorder %s735_s26, %s731_s23  ;;  %p739_p4 = scmp.lt.u32.totalorder %s731_s23, %s1017_s4 }
 0x15b   : > { %p733_p1 = pnand %p732_p9, %p926_p10 }
 0x15c   : > { %p738_p13 = por %p737_p7, %p736_p3 }
 0x15d   : > { %p734_p2 = pneg %p733_p1 }
 0x15e   : > { %p740_p6 = por %p739_p4, %p738_p13 }
 0x160   : > { %p741_p8 = pnand %p740_p6, %p734_p2 }
 0x162   : > { %744 = shalt.err (!%p741_p8)
}
 0x163   : > { %s810_s8 = smov 128   ;;  %s811_s17 = smov 8  }
 0x164   : > { %588 = dma.vmem_to_hbm [thread:$0]  (%p926_p10), %s1012_s19, 1024, %s1017_s4, %s338_s12, %s810_s8, %s810_s8, %s811_s17  }
 0x165 PF: > { %s367_s21 = sand.u32 1, %s783_s9   ;;  %p1086_p12 = scmp.ne.s32.totalorder %s1076_s20, 0 }
 0x166   : > { %p1087_p11 = scmp.ge.s32.totalorder %s803_s14, 2  ;;  %s368_s6 = scalar_lea.sflag [#allocation4], %s367_s21 }
 0x168   : > { %p599_p0 = pnand %p1087_p11, %p1086_p12 }
 0x16a   : > { %778 = dma.done.wait (!%p599_p0), %s368_s6, 1024  }
 0x16b   : > { %780 = vsyncadd (!%p599_p0), %s368_s6, 4294966272  ;;  %s19_s14 = sadd.s32 1, %s803_s14   ;;  %s1088_s9 = smov %s787_s10 }
 0x16c   : > { %p16_p5 = scmp.ge.s32.totalorder %s19_s14, 4   ;;  %s1089_s10 = smov %s791_s11 }
 0x16d   : > { %s1090_s11 = smov %s935_s28  ;;  %s1091_s12 = smov %s799_s13 }
 0x16e   : > { %s1092_s13 = smov %s1094_s25  ;;  %18 = sbr.rel (!%p16_p5) target bundleno = 7 (0x7), region = 78 }
 0x175   :  { %373 = vsyncpa [#allocation3], 1 }
 0x176   :  { %375 = vsyncpa [#allocation3 + $0x1], 1 }
 0x177   :  { %376 = vsyncpa [#allocation6], 1 }
 0x178   :  { %377 = vsyncpa [#allocation4], 1 }
 0x179   :  { %379 = vsyncpa [#allocation4 + $0x1], 1 }

</bundles_post_ra>
